<compile_context>
chip_gen: v6e
topology: v6e:2x2x1
jax: 0.10.0
libtpu: 0.0.40
codegen_flags: <defaults>
</compile_context>

<pallas_src>
import jax
import jax.numpy as jnp
from jax.experimental import pallas as pl
from jax.experimental.pallas import tpu as pltpu


def _round_up(n, m):
    return ((n + m - 1) // m) * m


# ----------------------------------------------------------------------------- 
# Kernel: one batch tile -> logits tile.  Weights/biases are VMEM-resident.
# -----------------------------------------------------------------------------
def summer_kernel(x_ref, w1_ref, b1_ref, w2_ref, b2_ref, logits_ref):
    # Cast the activation tile to bf16 in-kernel (VPU work, hidden under MXU).
    x = x_ref[...].astype(jnp.bfloat16)

    # encoder: Linear (bf16 MXU operands, f32 accumulate) + bias + ReLU in f32.
    h = jnp.dot(x, w1_ref[...], preferred_element_type=jnp.float32)
    h = jnp.maximum(h + b1_ref[...], 0.0)

    # classifier: Linear -> logits (bf16 MXU operands, f32 accumulate) + bias.
    logits = jnp.dot(h.astype(jnp.bfloat16), w2_ref[...],
                     preferred_element_type=jnp.float32)
    logits_ref[...] = logits + b2_ref[...]


# -----------------------------------------------------------------------------
# One-time parameter preparation (call at model init; weights are static).
# -----------------------------------------------------------------------------
def prepare_summer_params(w1, b1, w2, b2, *, lane=128):
    """Pad H/C to lane multiples and cast weights to bf16, ONCE."""
    D_in, H = w1.shape
    C = w2.shape[1]
    H_pad = _round_up(H, lane)
    C_pad = _round_up(C, lane)

    w1p = jnp.zeros((D_in, H_pad), jnp.bfloat16).at[:, :H].set(
        w1.astype(jnp.bfloat16))
    b1p = jnp.zeros((1, H_pad), jnp.float32).at[:, :H].set(
        b1.reshape(1, H).astype(jnp.float32))
    # Zero-padded rows of w2 / columns of b2 contribute exactly 0 to the
    # padded logits columns, which are sliced off before argmax.
    w2p = jnp.zeros((H_pad, C_pad), jnp.bfloat16).at[:H, :C].set(
        w2.astype(jnp.bfloat16))
    b2p = jnp.zeros((1, C_pad), jnp.float32).at[:, :C].set(
        b2.reshape(1, C).astype(jnp.float32))

    return {"w1": w1p, "b1": b1p, "w2": w2p, "b2": b2p,
            "num_classes": C, "hidden_pad": H_pad, "classes_pad": C_pad}


# -----------------------------------------------------------------------------
# Forward wrapper: returns (logits, predictions) like Summer.forward.
# -----------------------------------------------------------------------------
def summer_forward(x, params, *, tb=512):
    B, D_in = x.shape
    w1, b1, w2, b2 = params["w1"], params["b1"], params["w2"], params["b2"]
    C = params["num_classes"]
    H_pad = params["hidden_pad"]
    C_pad = params["classes_pad"]
    assert w1.shape[0] == D_in

    # --- batch tile selection -------------------------------------------------
    if B >= tb:
        pass                                   # stream tb-row tiles; ragged last block is fine
    elif B <= 128:
        tb = _round_up(B, 8)                   # single tile, no padded copy of x
    else:
        tb = _round_up(pl.cdiv(B, 2), 16)      # >=2 steps so both v7x cores get work
    grid = (pl.cdiv(B, tb),)

    # --- VMEM budget: single-buffer weights + double-buffered x / logits ------
    resident_bytes = (w1.size * 2 + w2.size * 2 + (b1.size + b2.size) * 4)
    stream_bytes = 2 * tb * D_in * x.dtype.itemsize + 2 * tb * C_pad * 4
    vmem_limit = int(min(max(resident_bytes + stream_bytes + (2 << 20),
                             16 * 1024 * 1024),
                         64 * 1024 * 1024))

    cost = pl.CostEstimate(
        flops=2 * B * (D_in * H_pad + H_pad * C_pad),
        bytes_accessed=int(x.size * x.dtype.itemsize + resident_bytes
                           + B * C_pad * 4),
        transcendentals=0,
    )

    resident_spec = pl.BlockSpec(memory_space=pltpu.MemorySpace.VMEM)

    logits_pad = pl.pallas_call(
        summer_kernel,
        out_shape=jax.ShapeDtypeStruct((B, C_pad), jnp.float32),
        grid=grid,
        in_specs=[
            pl.BlockSpec((tb, D_in), lambda i: (i, 0)),   # x: streamed (f32)
            resident_spec,                                 # w1: VMEM-resident
            resident_spec,                                 # b1
            resident_spec,                                 # w2
            resident_spec,                                 # b2
        ],
        out_specs=pl.BlockSpec((tb, C_pad), lambda i: (i, 0)),
        compiler_params=pltpu.CompilerParams(
            dimension_semantics=("parallel",),
            vmem_limit_bytes=vmem_limit,
        ),
        cost_estimate=cost,
    )(x, w1, b1, w2, b2)

    logits = logits_pad[:, :C]
    predictions = jnp.argmax(logits, axis=-1).astype(jnp.int32)
    return logits, predictions


if __name__ == "__main__":
    # Small, deterministic shapes.
    B, D_IN, H, C = 8, 32, 64, 16

    key = jax.random.PRNGKey(0)
    kx, k1, k2, k3, k4 = jax.random.split(key, 5)

    x = jax.random.normal(kx, (B, D_IN), dtype=jnp.float32)
    w1 = jax.random.normal(k1, (D_IN, H), dtype=jnp.float32) * (1.0 / jnp.sqrt(D_IN))
    b1 = jax.random.normal(k2, (1, H), dtype=jnp.float32) * 0.01
    w2 = jax.random.normal(k3, (H, C), dtype=jnp.float32) * (1.0 / jnp.sqrt(H))
    b2 = jax.random.normal(k4, (1, C), dtype=jnp.float32) * 0.01

    # Pad/cast the static parameters once ("init"), then run the forward pass.
    params = prepare_summer_params(w1, b1, w2, b2)
    logits, preds = summer_forward(x, params)
    jax.block_until_ready((logits, preds))

    # Pure-JAX reference mirroring the kernel's bf16-operand / f32-accumulate math.
    h_ref = jnp.maximum(
        jnp.dot(x.astype(jnp.bfloat16), w1.astype(jnp.bfloat16),
                preferred_element_type=jnp.float32) + b1, 0.0)
    logits_ref = jnp.dot(h_ref.astype(jnp.bfloat16), w2.astype(jnp.bfloat16),
                         preferred_element_type=jnp.float32) + b2
    preds_ref = jnp.argmax(logits_ref, axis=-1).astype(jnp.int32)

    assert logits.shape == (B, C)
    assert preds.shape == (B,)
    assert jnp.allclose(logits, logits_ref, atol=1e-3, rtol=1e-3)
    assert jnp.array_equal(preds, preds_ref)

    print("KERNEL_OK")
</pallas_src>

<mosaic_0001>
module attributes {stable_mosaic.version = 11 : i64} {
  func.func @summer_kernel(%arg0: i32, %arg1: memref<8x32xf32, #tpu.memory_space<vmem>>, %arg2: memref<32x128xbf16, #tpu.memory_space<vmem>>, %arg3: memref<1x128xf32, #tpu.memory_space<vmem>>, %arg4: memref<128x128xbf16, #tpu.memory_space<vmem>>, %arg5: memref<1x128xf32, #tpu.memory_space<vmem>>, %arg6: memref<8x128xf32, #tpu.memory_space<vmem>>) attributes {dimension_semantics = [#tpu.dimension_semantics<parallel>], iteration_bounds = array<i64: 1>, scalar_prefetch = 0 : i64, scratch_operands = 0 : i64, tpu.core_type = #tpu.core_type<tc>, window_params = [{transform_indices = @transform_0, window_bounds = array<i64: 8, 32>}, {pipeline_mode = #tpu.pipeline_mode<synchronous>, transform_indices = @transform_1, window_bounds = array<i64: 32, 128>}, {pipeline_mode = #tpu.pipeline_mode<synchronous>, transform_indices = @transform_2, window_bounds = array<i64: 1, 128>}, {pipeline_mode = #tpu.pipeline_mode<synchronous>, transform_indices = @transform_3, window_bounds = array<i64: 128, 128>}, {pipeline_mode = #tpu.pipeline_mode<synchronous>, transform_indices = @transform_4, window_bounds = array<i64: 1, 128>}, {transform_indices = @transform_5, window_bounds = array<i64: 8, 128>}]} {
    %c0 = arith.constant 0 : index
    %c0_0 = arith.constant 0 : index
    %0 = vector.load %arg1[%c0, %c0_0] : memref<8x32xf32, #tpu.memory_space<vmem>>, vector<8x32xf32>
    %1 = arith.truncf %0 : vector<8x32xf32> to vector<8x32xbf16>
    %c0_1 = arith.constant 0 : index
    %c0_2 = arith.constant 0 : index
    %2 = vector.load %arg2[%c0_1, %c0_2] : memref<32x128xbf16, #tpu.memory_space<vmem>>, vector<32x128xbf16>
    %cst = arith.constant dense<0.000000e+00> : vector<8x128xf32>
    %3 = tpu.matmul %1, %2, %cst {dimension_numbers = #tpu.dot_dimension_numbers<[1], [0], [0], [1], [0, 0, 1, 1], [], []>} : vector<8x32xbf16>, vector<32x128xbf16>, vector<8x128xf32> -> vector<8x128xf32>
    %c0_3 = arith.constant 0 : index
    %c0_4 = arith.constant 0 : index
    %4 = vector.load %arg3[%c0_3, %c0_4] : memref<1x128xf32, #tpu.memory_space<vmem>>, vector<1x128xf32>
    %5 = vector.broadcast %4 : vector<1x128xf32> to vector<8x128xf32>
    %6 = arith.addf %3, %5 : vector<8x128xf32>
    %cst_5 = arith.constant 0.000000e+00 : f32
    %7 = vector.broadcast %cst_5 : f32 to vector<8x128xf32>
    %8 = arith.maximumf %6, %7 : vector<8x128xf32>
    %9 = arith.truncf %8 : vector<8x128xf32> to vector<8x128xbf16>
    %c0_6 = arith.constant 0 : index
    %c0_7 = arith.constant 0 : index
    %10 = vector.load %arg4[%c0_6, %c0_7] : memref<128x128xbf16, #tpu.memory_space<vmem>>, vector<128x128xbf16>
    %cst_8 = arith.constant dense<0.000000e+00> : vector<8x128xf32>
    %11 = tpu.matmul %9, %10, %cst_8 {dimension_numbers = #tpu.dot_dimension_numbers<[1], [0], [0], [1], [0, 0, 1, 1], [], []>} : vector<8x128xbf16>, vector<128x128xbf16>, vector<8x128xf32> -> vector<8x128xf32>
    %c0_9 = arith.constant 0 : index
    %c0_10 = arith.constant 0 : index
    %12 = vector.load %arg5[%c0_9, %c0_10] : memref<1x128xf32, #tpu.memory_space<vmem>>, vector<1x128xf32>
    %13 = vector.broadcast %12 : vector<1x128xf32> to vector<8x128xf32>
    %14 = arith.addf %11, %13 : vector<8x128xf32>
    %c0_11 = arith.constant 0 : index
    %c0_12 = arith.constant 0 : index
    %15 = vector.load %arg6[%c0_11, %c0_12] : memref<8x128xf32, #tpu.memory_space<vmem>>, vector<8x128xf32>
    tpu.vector_store %arg6[%c0_11, %c0_12], %14 {strides = array<i32>} : memref<8x128xf32, #tpu.memory_space<vmem>>, vector<8x128xf32>,
    return
  }
  func.func @transform_0(%arg0: i32) -> (i32, i32) {
    %c0_i32 = arith.constant 0 : i32
    %c0_i32_0 = arith.constant 0 : i32
    return %arg0, %c0_i32 : i32, i32
  }
  func.func @transform_1(%arg0: i32) -> (i32, i32) {
    %c0_i32 = arith.constant 0 : i32
    %c0_i32_0 = arith.constant 0 : i32
    %c0_i32_1 = arith.constant 0 : i32
    return %c0_i32, %c0_i32_0 : i32, i32
  }
  func.func @transform_2(%arg0: i32) -> (i32, i32) {
    %c0_i32 = arith.constant 0 : i32
    %c0_i32_0 = arith.constant 0 : i32
    %c0_i32_1 = arith.constant 0 : i32
    return %c0_i32, %c0_i32_0 : i32, i32
  }
  func.func @transform_3(%arg0: i32) -> (i32, i32) {
    %c0_i32 = arith.constant 0 : i32
    %c0_i32_0 = arith.constant 0 : i32
    %c0_i32_1 = arith.constant 0 : i32
    return %c0_i32, %c0_i32_0 : i32, i32
  }
  func.func @transform_4(%arg0: i32) -> (i32, i32) {
    %c0_i32 = arith.constant 0 : i32
    %c0_i32_0 = arith.constant 0 : i32
    %c0_i32_1 = arith.constant 0 : i32
    return %c0_i32, %c0_i32_0 : i32, i32
  }
  func.func @transform_5(%arg0: i32) -> (i32, i32) {
    %c0_i32 = arith.constant 0 : i32
    %c0_i32_0 = arith.constant 0 : i32
    return %arg0, %c0_i32 : i32, i32
  }
}

</mosaic_0001>

<bundles_post_ra>
// kernel: tpu_custom_call.1
= control target key start
LH: loop header
LB: loop body
LE: loop exit
PB: predicated region body
PF: predicated region fallthrough
CT: control target
= control target key end

     0   :  { %10 = vsyncpa [#allocation3], 0  ;;  %s473_s0 = inlined_call_operand.hbm [shape: f32[8,32], index: 0, kind: input, shape index: {}]   ;;  %s474_s1 = inlined_call_operand.hbm [shape: bf16[32,128], index: 1, kind: input, shape index: {}]   ;;  %s475_s2 = inlined_call_operand.vmem [shape: f32[1,128], index: 2, kind: input, shape index: {}]   ;;  %s476_s3 = inlined_call_operand.hbm [shape: bf16[128,128], index: 3, kind: input, shape index: {}]   ;;  %s477_s4 = inlined_call_operand.vmem [shape: f32[1,128], index: 4, kind: input, shape index: {}]   ;;  %s478_s5 = inlined_call_operand.hbm [shape: f32[8,128], index: 5, kind: output, shape index: {}]  }
   0x1   :  { %11 = vsyncpa [#allocation6], 0 }
   0x2   :  { %12 = vsyncpa [#allocation4], 0  ;;  %s417_s18 = smov [#allocation5]  }
   0x3   :  { %s28_s19 = sshll.u32 %s417_s18, 4  ;;  %s29_s19 = int_to_ptr.vmem [resolvable:$true] %s28_s19 }
   0x4   :  { %s339_s20 = scalar_lea.vmem %s29_s19, 256  ;;  %p344_p1 = scmp.lt.s32.totalorder %s29_s19, %s29_s19 }
   0x5   :  { %p340_p0 = scmp.ne.s32.totalorder %s29_s19, %s339_s20  ;;  %p345_p2 = scmp.lt.s32.totalorder %s339_s20, %s339_s20 }
   0x7   :  { %p346_p3 = por %p345_p2, %p344_p1 }
   0x9   :  { %p347_p4 = pnand %p346_p3, %p340_p0 }
   0xb   :  { %350 = shalt.err (!%p347_p4)
}
   0xc   :  { %s418_s21 = smov 64   ;;  %s419_s22 = smov 4  }
   0xd   :  { %34 = dma.hbm_to_vmem [thread:$0]  %s474_s1, 256, %s29_s19, [#allocation6], %s418_s21, %s418_s21, %s419_s22  }
   0xe   :  { %s420_s25 = smov [#allocation2]   ;;  %s421_s27 = smov [#allocation7]  }
   0xf   :  { %s19_s26 = sshll.u32 %s420_s25, 4  ;;  %s42_s28 = sshll.u32 %s421_s27, 4  ;;  %s20_s26 = int_to_ptr.vmem [resolvable:$true] %s19_s26  ;;  %s43_s28 = int_to_ptr.vmem [resolvable:$true] %s42_s28 }
  0x10   :  { %s359_s29 = scalar_lea.vmem %s20_s26, 128  ;;  %p364_p6 = scmp.lt.s32.totalorder %s20_s26, %s20_s26 }
  0x11   :  { %p360_p5 = scmp.ne.s32.totalorder %s20_s26, %s359_s29  ;;  %p365_p7 = scmp.lt.s32.totalorder %s359_s29, %s359_s29 }
  0x13   :  { %p366_p8 = por %p365_p7, %p364_p6 }
  0x15   :  { %p367_p9 = pnand %p366_p8, %p360_p5 }
  0x17   :  { %370 = shalt.err (!%p367_p9)
}
  0x18   :  { %22 = dma.hbm_to_vmem [thread:$0]  %s473_s0, 128, %s20_s26, [#allocation3]  }
  0x19   :  { %s379_s7 = scalar_lea.vmem %s43_s28, 1024  ;;  %p384_p11 = scmp.lt.s32.totalorder %s43_s28, %s43_s28 }
  0x1a   :  { %p380_p10 = scmp.ne.s32.totalorder %s43_s28, %s379_s7  ;;  %p385_p12 = scmp.lt.s32.totalorder %s379_s7, %s379_s7 }
  0x1c   :  { %p386_p13 = por %p385_p12, %p384_p11 }
  0x1e   :  { %p387_p0 = pnand %p386_p13, %p380_p10 }
  0x20   :  { %390 = shalt.err (!%p387_p0)
}
  0x21   :  { %48 = dma.hbm_to_vmem [thread:$0]  %s476_s3, 1024, %s43_s28, [#allocation6], %s418_s21, %s418_s21, %s419_s22  }
  0x22   :  { %411 = dma.done.wait [#allocation3], 128  }
  0x23   :  { %412 = vsyncadd [#allocation3], 4294967168 }
  0x24   :  { %413 = dma.done.wait [#allocation6], 1280  }
  0x25   :  { %414 = vsyncadd [#allocation6], 4294966016  ;;  %v422_v0 = vmov 0.0   ;;  %vm423_vm0 = vmmov 0   ;;  %v321_v1 = vld [vmem:[#allocation5 + $0x8] sm:$0xff]   ;;  %v322_v2 = vld [vmem:[#allocation5] sm:$0xff]  }
  0x26   :  { %285 = vmatprep.subr.bf16.mxu0 %v422_v0  ;;  %289 = vmatprep.mubr.msk.bf16.mxu0 %vm423_vm0, %v422_v0  ;;  %v61_v3 = vld [vmem:[#allocation2] sm:$0xff]  ;;  %v323_v4 = vld [vmem:[#allocation7 + $0x38] sm:$0xff]   ;;  %v324_v6 = vld [vmem:[#allocation7 + $0x30] sm:$0xff]   ;;  %vm86_vm1 = vcmask 261120   ;;  %s424_s11 = smov [#allocation8]  }
  0x27   :  { %293 = vmatprep.subr.bf16.mxu1 %v422_v0  ;;  %309 = vmatprep.mubr.msk.bf16.mxu1 %vm423_vm0, %v422_v0  ;;  %v62_v5 = vpack.c.bf16 %v61_v3, %v61_v3  ;;  %v325_v7 = vld [vmem:[#allocation7 + $0x28] sm:$0xff]   ;;  %v326_v8 = vld [vmem:[#allocation7 + $0x20] sm:$0xff]   ;;  %v327_v9 = vld [vmem:[#allocation7 + $0x18] sm:$0xff]   ;;  %s250_s12 = sshll.u32 %s424_s11, 4  ;;  %s251_s12 = int_to_ptr.vmem [resolvable:$true] %s250_s12 }
  0x28   :  { %286 = vmatpush3.bf16.msra.mxu0 %v321_v1  ;;  %294 = vmatpush3.bf16.msra.mxu1 %v323_v4  ;;  %v328_v10 = vld [vmem:[#allocation7 + $0x10] sm:$0xff]   ;;  %v329_v11 = vld [vmem:[#allocation7 + $0x8] sm:$0xff]   ;;  %v330_v12 = vld [vmem:[#allocation7] sm:$0xff]   ;;  %p396_p2 = scmp.lt.s32.totalorder %s251_s12, %s251_s12 }
  0x29   :  { %287 = vmatprep.subr.bf16.mxu0 %v422_v0  ;;  %295 = vmatprep.subr.bf16.mxu1 %v422_v0  ;;  %v260_v13 = vld [vmem:[%s475_s2] ss:$0 sm:$0xff]  ;;  %s391_s2 = scalar_lea.vmem %s251_s12, 128 }
  0x2a   :  { %v264_v21 = vld [vmem:[%s477_s4] ss:$0 sm:$0xff]  ;;  %p392_p1 = scmp.ne.s32.totalorder %s251_s12, %s391_s2  ;;  %p397_p3 = scmp.lt.s32.totalorder %s391_s2, %s391_s2 }
  0x2c   :  { %288 = vmatpush3.bf16.msra.mxu0 %v322_v2  ;;  %296 = vmatpush3.bf16.msra.mxu1 %v324_v6  ;;  %p398_p4 = por %p397_p3, %p396_p2 }
  0x2d   :  { %297 = vmatprep.subr.bf16.mxu1 %v422_v0 }
  0x2e   :  { %p399_p5 = pnand %p398_p4, %p392_p1 }
  0x2f   :  { %290 = vmatmul.mubr.msk.bf16.vlgmr.msra.gmra.mxu0 %vm86_vm1, %v62_v5 }
  0x30   :  { %298 = vmatpush3.bf16.msra.mxu1 %v325_v7 }
  0x31   :  { %299 = vmatprep.subr.bf16.mxu1 %v422_v0 }
  0x34   :  { %300 = vmatpush3.bf16.msra.mxu1 %v326_v8 }
  0x35   :  { %301 = vmatprep.subr.bf16.mxu1 %v422_v0 }
  0x38   :  { %302 = vmatpush3.bf16.msra.mxu1 %v327_v9 }
  0x39   :  { %303 = vmatprep.subr.bf16.mxu1 %v422_v0 }
  0x3c   :  { %304 = vmatpush3.bf16.msra.mxu1 %v328_v10 }
  0x3d   :  { %305 = vmatprep.subr.bf16.mxu1 %v422_v0 }
  0x40   :  { %306 = vmatpush3.bf16.msra.mxu1 %v329_v11 }
  0x41   :  { %307 = vmatprep.subr.bf16.mxu1 %v422_v0 }
  0x44   :  { %308 = vmatpush3.bf16.msra.mxu1 %v330_v12 }
  0xef   :  { %v124_v14 = vpop.f32.mrf.mxu0 }
  0xf0   :  { %v125_v15 = vadd.f32 %v260_v13, %v124_v14 }
  0xf1   :  { %v291_v16 = vpop.f32.mrf.mxu0 }
  0xf2   :  { %v130_v17 = vmax.f32 %v125_v15, 0.0 }
  0xf3   :  { %v127_v18 = vpop.f32.mrf.mxu0 }
  0xf4   :  { %v131_v19 = vpack.c.bf16 %v130_v17, %v130_v17 }
  0xf5   :  { %v292_v20 = vpop.f32.mrf.mxu0 }
  0xf6   :  { %310 = vmatmul.mubr.bf16.vlgmr.msra.gmra.mxu1 %v131_v19 }
 0x1b6   :  { %v237_v22 = vpop.f32.mrf.mxu1 }
 0x1b7   :  { %v238_v23 = vadd.f32 %v264_v21, %v237_v22 }
 0x1b8   :  { %v311_v24 = vpop.f32.mrf.mxu1 }
 0x1b9   :  { %243 = vst [vmem:[#allocation8] sm:$0xff] %v238_v23 }
 0x1ba   :  { %v240_v25 = vpop.f32.mrf.mxu1 }
 0x1bb   :  { %402 = shalt.err (!%p399_p5)
}
 0x1bc   :  { %253 = dma.vmem_to_hbm [thread:$0]  %s251_s12, 128, %s478_s5, [#allocation4]   ;;  %v312_v26 = vpop.f32.mrf.mxu1 }
 0x1bd   :  { %415 = dma.done.wait [#allocation4], 128  }
 0x1be   :  { %416 = vsyncadd [#allocation4], 4294967168 }
 0x1bf   :  { %257 = vsyncpa [#allocation3], 1 }
 0x1c0   :  { %258 = vsyncpa [#allocation6], 1 }
 0x1c1   :  { %259 = vsyncpa [#allocation4], 1 }

</bundles_post_ra>
